<compile_context>
chip_gen: v7x
topology: tpu7x:2x2x1
jax: 0.10.0
libtpu: 0.0.40
codegen_flags: <defaults>
</compile_context>

<pallas_src>
import functools

import jax
import jax.numpy as jnp
from jax.experimental import pallas as pl
from jax.experimental.pallas import tpu as pltpu


VMEM_LIMIT = 32 * 1024 * 1024


def _round_up(x, m):
    return (x + m - 1) // m * m


def _pick_time_chunk(T, max_chunk=16):
    for tc in range(min(max_chunk, T), 0, -1):
        if T % tc == 0:
            return tc
    return 1


# ----------------------------------------------------------------------------
# Generic tiled matmul + bias kernel (used for the hoisted Gi projection and FC)
#   out[i*tm:(i+1)*tm, :] = x_tile @ w + b      (bf16 operands, f32 accumulate)
# ----------------------------------------------------------------------------
def _matmul_bias_kernel(x_ref, w_ref, b_ref, o_ref):
    acc = jnp.dot(x_ref[...], w_ref[...], preferred_element_type=jnp.float32)
    o_ref[...] = (acc + b_ref[...]).astype(o_ref.dtype)


def matmul_bias(x2d, w, b, out_dtype=jnp.float32, tm=512):
    M, K = x2d.shape
    N = w.shape[1]
    tm = min(tm, _round_up(M, 8))
    Mp = _round_up(M, tm)
    if Mp != M:
        x2d = jnp.pad(x2d, ((0, Mp - M), (0, 0)))
    out = pl.pallas_call(
        _matmul_bias_kernel,
        out_shape=jax.ShapeDtypeStruct((Mp, N), out_dtype),
        grid_spec=pltpu.PrefetchScalarGridSpec(
            num_scalar_prefetch=0,
            grid=(Mp // tm,),
            in_specs=[
                pl.BlockSpec((tm, K), lambda i: (i, 0)),
                pl.BlockSpec((K, N), lambda i: (0, 0)),
                pl.BlockSpec((1, N), lambda i: (0, 0)),
            ],
            out_specs=pl.BlockSpec((tm, N), lambda i: (i, 0)),
        ),
        compiler_params=pltpu.CompilerParams(
            dimension_semantics=("parallel",),
            vmem_limit_bytes=VMEM_LIMIT),
    )(x2d, w, b.reshape(1, N).astype(jnp.float32))
    return out[:M] if Mp != M else out


# ----------------------------------------------------------------------------
# GRU recurrence kernel (PyTorch gate order [r, z, n]):
#   Gi (precomputed) already holds  x@W_ih + b_ih + [b_hr, b_hz, 0]
#   per step:  gh = h @ W_hh
#       r = sigmoid(gi_r + gh_r)
#       z = sigmoid(gi_z + gh_z)
#       n = tanh(gi_n + r * (gh_n + b_hn))
#       h = (1 - z) * n + z * h
# Grid = time chunks (sequential -> "arbitrary"); hidden state lives in VMEM scratch.
# ----------------------------------------------------------------------------
def _gru_seq_kernel(gi_ref, h0_ref, whh_ref, bhhn_ref, y_ref, hT_ref, h_scr,
                    *, hidden_pad, chunk):
    c = pl.program_id(0)
    Hp = hidden_pad

    @pl.when(c == 0)
    def _():
        h_scr[...] = h0_ref[...].astype(jnp.float32)

    whh = whh_ref[...]            # (Hp, 3Hp) bf16, VMEM-resident across the grid
    bhh_n = bhhn_ref[...]         # (1, Hp) f32

    def step(i, h):
        gi = gi_ref[i]            # (Bp, 3Hp) f32
        gh = jnp.dot(h.astype(jnp.bfloat16), whh,
                     preferred_element_type=jnp.float32)
        r = jax.nn.sigmoid(gi[:, 0:Hp] + gh[:, 0:Hp])
        z = jax.nn.sigmoid(gi[:, Hp:2 * Hp] + gh[:, Hp:2 * Hp])
        n = jnp.tanh(gi[:, 2 * Hp:3 * Hp] + r * (gh[:, 2 * Hp:3 * Hp] + bhh_n))
        h_new = (1.0 - z) * n + z * h
        y_ref[i] = h_new.astype(y_ref.dtype)
        return h_new

    h_final = jax.lax.fori_loop(0, chunk, step, h_scr[...], unroll=True)
    h_scr[...] = h_final

    @pl.when(c == pl.num_programs(0) - 1)
    def _():
        hT_ref[...] = h_final.astype(hT_ref.dtype)


def gru_layer(gi_tbg, h0_p, whh_p, bhh_n_p, hidden_pad, time_chunk):
    """gi_tbg: (T, Bp, 3Hp) f32; returns y: (T, Bp, Hp) bf16, h_T: (Bp, Hp) f32."""
    T, Bp, _ = gi_tbg.shape
    Hp = hidden_pad
    Tc = time_chunk
    kernel = functools.partial(_gru_seq_kernel, hidden_pad=Hp, chunk=Tc)
    return pl.pallas_call(
        kernel,
        out_shape=(
            jax.ShapeDtypeStruct((T, Bp, Hp), jnp.bfloat16),
            jax.ShapeDtypeStruct((Bp, Hp), jnp.float32),
        ),
        grid_spec=pltpu.PrefetchScalarGridSpec(
            num_scalar_prefetch=0,
            grid=(T // Tc,),
            in_specs=[
                pl.BlockSpec((Tc, Bp, 3 * Hp), lambda c: (c, 0, 0)),
                pl.BlockSpec((Bp, Hp), lambda c: (0, 0)),
                pl.BlockSpec((Hp, 3 * Hp), lambda c: (0, 0)),
                pl.BlockSpec((1, Hp), lambda c: (0, 0)),
            ],
            out_specs=(
                pl.BlockSpec((Tc, Bp, Hp), lambda c: (c, 0, 0)),
                pl.BlockSpec((Bp, Hp), lambda c: (0, 0)),
            ),
            scratch_shapes=[pltpu.VMEM((Bp, Hp), jnp.float32)],
        ),
        compiler_params=pltpu.CompilerParams(
            dimension_semantics=("arbitrary",),   # recurrence: sequential grid
            vmem_limit_bytes=VMEM_LIMIT),
    )(gi_tbg, h0_p, whh_p, bhh_n_p)


# ----------------------------------------------------------------------------
# Parameter init (logical PyTorch shapes, pre-transposed for x @ W)
# ----------------------------------------------------------------------------
def init_params(key, len_alphabet, embedding_dim, hidden_dim, num_layers):
    keys = jax.random.split(key, 2 + 4 * num_layers + 2)
    ki = iter(keys)
    scale = 0.1
    params = {
        "embedding": scale * jax.random.normal(
            next(ki), (len_alphabet, embedding_dim), jnp.float32),
        "gru": [],
        # PyTorch fc weight is (A, H); stored transposed (H, A)
        "fc_w": scale * jax.random.normal(
            next(ki), (hidden_dim, len_alphabet), jnp.float32),
        "fc_b": scale * jax.random.normal(
            next(ki), (len_alphabet,), jnp.float32),
    }
    for layer in range(num_layers):
        din = embedding_dim if layer == 0 else hidden_dim
        params["gru"].append({
            # PyTorch weight_ih_l{k} is (3H, din); stored transposed (din, 3H)
            "wih": scale * jax.random.normal(next(ki), (din, 3 * hidden_dim), jnp.float32),
            "whh": scale * jax.random.normal(next(ki), (hidden_dim, 3 * hidden_dim), jnp.float32),
            "bih": scale * jax.random.normal(next(ki), (3 * hidden_dim,), jnp.float32),
            "bhh": scale * jax.random.normal(next(ki), (3 * hidden_dim,), jnp.float32),
        })
    return params


def _pad_gate_cols(w, h, hp):
    """Pad the concatenated [r|z|n] gate axis (last dim, size 3h) per-gate to 3hp."""
    parts = []
    for g in range(3):
        blk = w[..., g * h:(g + 1) * h]
        pad = [(0, 0)] * (w.ndim - 1) + [(0, hp - h)]
        parts.append(jnp.pad(blk, pad))
    return jnp.concatenate(parts, axis=-1)


def prepare_params(params, hidden_dim, len_alphabet):
    """Pad to (8,128)-friendly shapes, fold b_hh[r,z] into the Gi bias, cast MXU operands to bf16."""
    H, A = hidden_dim, len_alphabet
    Hp, Ap = _round_up(H, 128), _round_up(A, 128)
    E = params["embedding"].shape[1]
    prep = {
        "meta": dict(H=H, Hp=Hp, A=A, Ap=Ap, E=E, L=len(params["gru"])),
        "embedding": params["embedding"].astype(jnp.bfloat16),
        "fc_w": jnp.pad(params["fc_w"], ((0, Hp - H), (0, Ap - A))).astype(jnp.bfloat16),
        "fc_b": jnp.pad(params["fc_b"], (0, Ap - A)).astype(jnp.float32),
        "gru": [],
    }
    for layer, p in enumerate(params["gru"]):
        din = p["wih"].shape[0]
        din_p = din if layer == 0 else Hp          # layer-0 keeps raw embedding dim as K
        wih = _pad_gate_cols(p["wih"], H, Hp)
        wih = jnp.pad(wih, ((0, din_p - din), (0, 0)))
        whh = _pad_gate_cols(p["whh"], H, Hp)
        whh = jnp.pad(whh, ((0, Hp - H), (0, 0)))
        bih = _pad_gate_cols(p["bih"], H, Hp)      # (3Hp,)
        bhh = _pad_gate_cols(p["bhh"], H, Hp)      # (3Hp,)
        b_gi = bih.at[:2 * Hp].add(bhh[:2 * Hp])   # fold b_hr, b_hz into the hoisted projection
        prep["gru"].append(dict(
            wih=wih.astype(jnp.bfloat16),
            whh=whh.astype(jnp.bfloat16),
            b_gi=b_gi.astype(jnp.float32),                         # (3Hp,)
            bhh_n=bhh[2 * Hp:].reshape(1, Hp).astype(jnp.float32),  # (1, Hp)
        ))
    return prep


# ----------------------------------------------------------------------------
# Full forward pass == LanguageModel.forward(x, h)
# ----------------------------------------------------------------------------
def language_model_forward(prep, tokens, h0=None):
    meta = prep["meta"]
    H, Hp, A, Ap, E, L = meta["H"], meta["Hp"], meta["A"], meta["Ap"], meta["E"], meta["L"]
    B, T = tokens.shape
    Bp = _round_up(B, 8)
    Tc = _pick_time_chunk(T)

    # Time-major token layout (tiny int transpose); pad batch to the sublane tile.
    tok_tb = tokens.T
    if Bp != B:
        tok_tb = jnp.pad(tok_tb, ((0, 0), (0, Bp - B)))
    x = jnp.take(prep["embedding"], tok_tb, axis=0)          # (T, Bp, E) bf16 -- glue gather

    if h0 is None:
        h0_p = jnp.zeros((L, Bp, Hp), jnp.float32)
    else:
        h0_p = jnp.zeros((L, Bp, Hp), jnp.float32).at[:, :B, :H].set(h0.astype(jnp.float32))

    layer_in = x.reshape(T * Bp, E)                           # bf16
    finals = []
    for layer in range(L):
        lp = prep["gru"][layer]
        # Hoisted time-parallel input projection: one big MXU matmul over all steps.
        gi = matmul_bias(layer_in, lp["wih"], lp["b_gi"], out_dtype=jnp.float32)
        gi = gi.reshape(T, Bp, 3 * Hp)
        y, h_last = gru_layer(gi, h0_p[layer], lp["whh"], lp["bhh_n"], Hp, Tc)
        finals.append(h_last)
        layer_in = y.reshape(T * Bp, Hp)                      # bf16, feeds next layer / FC
    h_out = jnp.stack(finals, axis=0)[:, :B, :H]              # (L, B, H)

    # Final projection as one big tiled matmul; single cheap layout pass back to batch-first.
    logits = matmul_bias(layer_in, prep["fc_w"], prep["fc_b"], out_dtype=jnp.float32)
    logits = logits.reshape(T, Bp, Ap)
    logits = jnp.transpose(logits, (1, 0, 2))[:B, :, :A]      # (B, T, A)
    return logits, h_out

# TODO(synk): LanguageModel.sample() (torch.multinomial + np.unique de-dup) is host-side
# sampling logic, not part of the forward hot path; not implemented as a kernel.


if __name__ == "__main__":
    # Small shapes consistent with the module's forward
    B, T = 2, 8                    # batch, sequence (len_molecule)
    LEN_ALPHABET = 16
    EMBEDDING_DIM = 16
    HIDDEN_DIM = 32
    NUM_LAYERS = 2

    key = jax.random.PRNGKey(0)
    pkey, tkey = jax.random.split(key)
    logical_params = init_params(pkey, LEN_ALPHABET, EMBEDDING_DIM, HIDDEN_DIM, NUM_LAYERS)
    prep = prepare_params(logical_params, HIDDEN_DIM, LEN_ALPHABET)
    tokens = jax.random.randint(tkey, (B, T), 0, LEN_ALPHABET, dtype=jnp.int32)

    logits, h = language_model_forward(prep, tokens)
    logits, h = jax.block_until_ready((logits, h))

    assert logits.shape == (B, T, LEN_ALPHABET), logits.shape
    assert h.shape == (NUM_LAYERS, B, HIDDEN_DIM), h.shape
    assert bool(jnp.all(jnp.isfinite(logits))) and bool(jnp.all(jnp.isfinite(h)))
    print("KERNEL_OK")
</pallas_src>

<mosaic_0001>
module attributes {stable_mosaic.version = 11 : i64} {
  func.func @_matmul_bias_kernel(%arg0: i32, %arg1: memref<64x16xbf16, #tpu.memory_space<vmem>>, %arg2: memref<16x384xbf16, #tpu.memory_space<vmem>>, %arg3: memref<1x384xf32, #tpu.memory_space<vmem>>, %arg4: memref<64x384xf32, #tpu.memory_space<vmem>>) attributes {dimension_semantics = [#tpu.dimension_semantics<parallel>], iteration_bounds = array<i64: 1>, scalar_prefetch = 0 : i64, scratch_operands = 0 : i64, tpu.core_type = #tpu.core_type<tc>, window_params = [{transform_indices = @transform_0, window_bounds = array<i64: 64, 16>}, {pipeline_mode = #tpu.pipeline_mode<synchronous>, transform_indices = @transform_1, window_bounds = array<i64: 16, 384>}, {pipeline_mode = #tpu.pipeline_mode<synchronous>, transform_indices = @transform_2, window_bounds = array<i64: 1, 384>}, {transform_indices = @transform_3, window_bounds = array<i64: 64, 384>}]} {
    %c0 = arith.constant 0 : index
    %c0_0 = arith.constant 0 : index
    %0 = vector.load %arg1[%c0, %c0_0] : memref<64x16xbf16, #tpu.memory_space<vmem>>, vector<64x16xbf16>
    %c0_1 = arith.constant 0 : index
    %c0_2 = arith.constant 0 : index
    %1 = vector.load %arg2[%c0_1, %c0_2] : memref<16x384xbf16, #tpu.memory_space<vmem>>, vector<16x384xbf16>
    %cst = arith.constant dense<0.000000e+00> : vector<64x384xf32>
    %2 = tpu.matmul %0, %1, %cst {dimension_numbers = #tpu.dot_dimension_numbers<[1], [0], [0], [1], [0, 0, 1, 1], [], []>} : vector<64x16xbf16>, vector<16x384xbf16>, vector<64x384xf32> -> vector<64x384xf32>
    %c0_3 = arith.constant 0 : index
    %c0_4 = arith.constant 0 : index
    %3 = vector.load %arg3[%c0_3, %c0_4] : memref<1x384xf32, #tpu.memory_space<vmem>>, vector<1x384xf32>
    %4 = vector.broadcast %3 : vector<1x384xf32> to vector<64x384xf32>
    %5 = arith.addf %2, %4 : vector<64x384xf32>
    %c0_5 = arith.constant 0 : index
    %c0_6 = arith.constant 0 : index
    %6 = vector.load %arg4[%c0_5, %c0_6] : memref<64x384xf32, #tpu.memory_space<vmem>>, vector<64x384xf32>
    tpu.vector_store %arg4[%c0_5, %c0_6], %5 {strides = array<i32>} : memref<64x384xf32, #tpu.memory_space<vmem>>, vector<64x384xf32>,
    return
  }
  func.func @transform_0(%arg0: i32) -> (i32, i32) {
    %c0_i32 = arith.constant 0 : i32
    %c0_i32_0 = arith.constant 0 : i32
    return %arg0, %c0_i32 : i32, i32
  }
  func.func @transform_1(%arg0: i32) -> (i32, i32) {
    %c0_i32 = arith.constant 0 : i32
    %c0_i32_0 = arith.constant 0 : i32
    %c0_i32_1 = arith.constant 0 : i32
    return %c0_i32, %c0_i32_0 : i32, i32
  }
  func.func @transform_2(%arg0: i32) -> (i32, i32) {
    %c0_i32 = arith.constant 0 : i32
    %c0_i32_0 = arith.constant 0 : i32
    %c0_i32_1 = arith.constant 0 : i32
    return %c0_i32, %c0_i32_0 : i32, i32
  }
  func.func @transform_3(%arg0: i32) -> (i32, i32) {
    %c0_i32 = arith.constant 0 : i32
    %c0_i32_0 = arith.constant 0 : i32
    return %arg0, %c0_i32 : i32, i32
  }
}

</mosaic_0001>

<bundles_post_ra>
// kernel: tpu_custom_call.1
= control target key start
LH: loop header
LB: loop body
LE: loop exit
PB: predicated region body
PF: predicated region fallthrough
CT: control target
= control target key end

     0   :  { %v340_v2 = vmov 0   ;;  %vm81_vm0 = vcmask 130048   ;;  %s428_s0 = inlined_call_operand.vmem [shape: bf16[64,16], index: 0, kind: input, shape index: {}]   ;;  %s429_s1 = inlined_call_operand.vmem [shape: bf16[16,384], index: 1, kind: input, shape index: {}]   ;;  %s430_s2 = inlined_call_operand.vmem [shape: f32[1,384], index: 2, kind: input, shape index: {}]   ;;  %s431_s3 = inlined_call_operand.hbm [shape: f32[64,384], index: 3, kind: output, shape index: {}]  }
   0x1   :  { %v308_v0 = vld [vmem:[%s429_s1 + $0x4] ss:$12 sps:$4 sm:$0xff]   ;;  %v310_v1 = vld [vmem:[%s429_s1] ss:$12 sps:$4 sm:$0xff]   ;;  %126 = vmatprep.mubr.bf16.mxu0 %v340_v2  ;;  %156 = vmatprep.mubr.bf16.mxu1 %v340_v2  ;;  %v312_v4 = vld [vmem:[%s428_s0 + $0x18] sm:$0xff]  }
   0x2   :  { %94 = vmatprep.subr.bf16.mxu0 %v308_v0  ;;  %302 = vmatprep.subr.bf16.mxu1 %v308_v0  ;;  %v311_v3 = vld [vmem:[%s428_s0] sm:$0xff]   ;;  %v313_v5 = vld [vmem:[%s429_s1 + $0x8] ss:$12 sps:$4 sm:$0xff]  }
   0x3   :  { %95 = vmatpush1.bf16.msra.mxu0 %v310_v1  ;;  %303 = vmatpush1.bf16.msra.mxu1 %v310_v1 }
   0x6   :  { %279 = vmatmul.mubr.msk.bf16.vlgmr.msra.gmra.mrb[0].mxu0 %vm81_vm0, %v311_v3  ;;  %282 = vmatmul.mubr.msk.bf16.vlgmr.msra.gmra.mrb[0].mxu1 %vm81_vm0, %v312_v4 }
   0x7   :  { %8 = vsyncpa [#allocation3], 0  ;;  %292 = vmatprep.subr.bf16.mxu1 %v313_v5  ;;  %136 = vmatprep.mubr.bf16.mxu0 %v340_v2  ;;  %v314_v6 = vld [vmem:[%s428_s0 + $0x8] sm:$0xff]   ;;  %v315_v7 = vld [vmem:[%s428_s0 + $0x10] sm:$0xff]   ;;  %v30_v8 = vlaneseq  ;;  %s341_s0 = smov [#allocation2]  }
   0x8   :  { %293 = vmatpush3.bf16.msra.mxu1 %v313_v5  ;;  %294 = vmatprep.mubr.msk.bf16.mxu1 %vm81_vm0, %v311_v3  ;;  %v28_v11 = vld [vmem:[%s430_s2] sm:$0x7]  ;;  %s261_s2 = sshll.u32 %s341_s0, 4  ;;  %s262_s2 = int_to_ptr.vmem [resolvable:$true] %s261_s2 }
   0x9   :  { %v31_v9 = vshrl.u32 %v30_v8, 7  ;;  %s316_s27 = scalar_lea.vmem %s262_s2, 3072  ;;  %p321_p1 = scmp.lt.s32.totalorder %s262_s2, %s262_s2 }
   0xa   :  { %p317_p0 = scmp.ne.s32.totalorder %s262_s2, %s316_s27  ;;  %p322_p2 = scmp.lt.s32.totalorder %s316_s27, %s316_s27 }
   0xb   :  { %v32_v10 = vsub.s32 0, %v31_v9  ;;  %v36_v12 = vsub.s32 1, %v31_v9  ;;  %v40_v21 = vsub.s32 2, %v31_v9 }
   0xc   :  { %p323_p3 = por %p322_p2, %p321_p1 }
   0xd   :  { %v396_v13 = vrot.slane %v28_v11, %v32_v10  ;;  %v398_v14 = vrot.slane %v28_v11, %v36_v12  ;;  %v41_v32 = vrot.slane %v28_v11, %v40_v21 }
   0xe   :  { %280 = vmatmul.mubr.msk.bf16.gmra.mrb[4].mxu0 %vm81_vm0, %v314_v6  ;;  %295 = vmatmul.mubr.msk.bf16.vlgmr.msra.gmra.mrb[4].mxu1 %vm81_vm0, %v314_v6  ;;  %p324_p4 = pnand %p323_p3, %p317_p0 }
   0xf   :  { %146 = vmatprep.mubr.bf16.mxu0 %v340_v2  ;;  %298 = vmatprep.mubr.msk.bf16.mxu1 %vm81_vm0, %v315_v7 }
  0x16   :  { %281 = vmatmul.mubr.msk.bf16.gmra.mrb[8].mxu0 %vm81_vm0, %v315_v7  ;;  %299 = vmatmul.mubr.msk.bf16.gmra.mrb[8].mxu1 %vm81_vm0, %v312_v4 }
  0xd9   :  { %v128_v15 = vpop.f32.mrb[0].mxu0  ;;  %v158_v16 = vpop.f32.mrb[0].mxu1 }
  0xda   :  { %v129_v17 = vadd.f32 %v128_v15, %v396_v13  ;;  %v159_v18 = vadd.f32 %v158_v16, %v396_v13  ;;  %v130_v19 = vpop.f32.mrb[1].mxu0  ;;  %v160_v20 = vpop.f32.mrb[1].mxu1 }
  0xdb   :  { %v131_v22 = vadd.f32 %v130_v19, %v398_v14  ;;  %v161_v23 = vadd.f32 %v160_v20, %v398_v14  ;;  %v132_v24 = vpop.f32.mrb[2].mxu0  ;;  %v162_v25 = vpop.f32.mrb[2].mxu1 }
  0xdc   :  { %232 = vst [vmem:[#allocation2] sm:$0xff] %v129_v17  ;;  %250 = vst [vmem:[#allocation2 + $0x90] sm:$0xff] %v159_v18  ;;  %v133_v26 = vadd.f32 %v132_v24, %v396_v13  ;;  %v163_v27 = vadd.f32 %v162_v25, %v396_v13  ;;  %v134_v28 = vpop.f32.mrb[3].mxu0  ;;  %v164_v29 = vpop.f32.mrb[3].mxu1 }
  0xdd   :  { %233 = vst [vmem:[#allocation2 + $0x8] sm:$0xff] %v131_v22  ;;  %251 = vst [vmem:[#allocation2 + $0x98] sm:$0xff] %v161_v23  ;;  %v135_v30 = vadd.f32 %v134_v28, %v398_v14  ;;  %v165_v31 = vadd.f32 %v164_v29, %v398_v14 }
  0xde   :  { %235 = vst [vmem:[#allocation2 + $0x18] sm:$0xff] %v133_v26  ;;  %253 = vst [vmem:[#allocation2 + $0xa8] sm:$0xff] %v163_v27 }
  0xdf   :  { %236 = vst [vmem:[#allocation2 + $0x20] sm:$0xff] %v135_v30  ;;  %254 = vst [vmem:[#allocation2 + $0xb0] sm:$0xff] %v165_v31 }
  0xe1   :  { %v138_v33 = vpop.f32.mrb[4].mxu0  ;;  %v296_v34 = vpop.f32.mrb[4].mxu1 }
  0xe2   :  { %v139_v35 = vadd.f32 %v138_v33, %v396_v13  ;;  %v210_v36 = vadd.f32 %v296_v34, %v41_v32  ;;  %v140_v37 = vpop.f32.mrb[5].mxu0  ;;  %v201_v38 = vpop.f32.mrb[5].mxu1 }
  0xe3   :  { %v141_v39 = vadd.f32 %v140_v37, %v398_v14  ;;  %v202_v40 = vadd.f32 %v201_v38, %v41_v32  ;;  %v142_v41 = vpop.f32.mrb[6].mxu0  ;;  %v297_v42 = vpop.f32.mrb[6].mxu1 }
  0xe4   :  { %238 = vst [vmem:[#allocation2 + $0x30] sm:$0xff] %v139_v35  ;;  %240 = vst [vmem:[#allocation2 + $0x40] sm:$0xff] %v210_v36  ;;  %v143_v43 = vadd.f32 %v142_v41, %v396_v13  ;;  %v213_v44 = vadd.f32 %v297_v42, %v41_v32  ;;  %v144_v45 = vpop.f32.mrb[7].mxu0  ;;  %v204_v46 = vpop.f32.mrb[7].mxu1 }
  0xe5   :  { %239 = vst [vmem:[#allocation2 + $0x38] sm:$0xff] %v141_v39  ;;  %234 = vst [vmem:[#allocation2 + $0x10] sm:$0xff] %v202_v40  ;;  %v145_v47 = vadd.f32 %v144_v45, %v398_v14  ;;  %v205_v48 = vadd.f32 %v204_v46, %v41_v32 }
  0xe6   :  { %241 = vst [vmem:[#allocation2 + $0x48] sm:$0xff] %v143_v43  ;;  %243 = vst [vmem:[#allocation2 + $0x58] sm:$0xff] %v213_v44 }
  0xe7   :  { %242 = vst [vmem:[#allocation2 + $0x50] sm:$0xff] %v145_v47  ;;  %237 = vst [vmem:[#allocation2 + $0x28] sm:$0xff] %v205_v48 }
  0xe9   :  { %v148_v49 = vpop.f32.mrb[8].mxu0  ;;  %v300_v50 = vpop.f32.mrb[8].mxu1 }
  0xea   :  { %v149_v51 = vadd.f32 %v148_v49, %v396_v13  ;;  %v226_v52 = vadd.f32 %v300_v50, %v41_v32  ;;  %v150_v53 = vpop.f32.mrb[9].mxu0  ;;  %v217_v54 = vpop.f32.mrb[9].mxu1 }
  0xeb   :  { %v151_v55 = vadd.f32 %v150_v53, %v398_v14  ;;  %v218_v56 = vadd.f32 %v217_v54, %v41_v32  ;;  %v152_v57 = vpop.f32.mrb[10].mxu0  ;;  %v301_v58 = vpop.f32.mrb[10].mxu1 }
  0xec   :  { %244 = vst [vmem:[#allocation2 + $0x60] sm:$0xff] %v149_v51  ;;  %252 = vst [vmem:[#allocation2 + $0xa0] sm:$0xff] %v226_v52  ;;  %v153_v59 = vadd.f32 %v152_v57, %v396_v13  ;;  %v229_v60 = vadd.f32 %v301_v58, %v41_v32  ;;  %v154_v61 = vpop.f32.mrb[11].mxu0  ;;  %v220_v62 = vpop.f32.mrb[11].mxu1 }
  0xed   :  { %245 = vst [vmem:[#allocation2 + $0x68] sm:$0xff] %v151_v55  ;;  %246 = vst [vmem:[#allocation2 + $0x70] sm:$0xff] %v218_v56  ;;  %v155_v63 = vadd.f32 %v154_v61, %v398_v14  ;;  %v221_v0 = vadd.f32 %v220_v62, %v41_v32 }
  0xee   :  { %247 = vst [vmem:[#allocation2 + $0x78] sm:$0xff] %v153_v59  ;;  %255 = vst [vmem:[#allocation2 + $0xb8] sm:$0xff] %v229_v60 }
  0xef   :  { %248 = vst [vmem:[#allocation2 + $0x80] sm:$0xff] %v155_v63  ;;  %249 = vst [vmem:[#allocation2 + $0x88] sm:$0xff] %v221_v0 }
  0xf0   :  { %327 = shalt.err (!%p324_p4)
}
  0xf1   :  { %s328_s30 = scalar_lea.hbm %s431_s3, 3072 }
  0xf2   :  { %p329_p5 = scmp.ne.s32.totalorder %s431_s3, %s328_s30  ;;  %p332_p6 = scmp.lt.u32.totalorder %s328_s30, %s431_s3 }
  0xf4   :  { %p334_p7 = pnand %p332_p6, %p329_p5 }
  0xf6   :  { %337 = shalt.err (!%p334_p7)
}
  0xf7   :  { %s342_s8 = smov 384   ;;  %s343_s9 = smov 24  }
  0xf8   :  { %267 = dma.vmem_to_hbm [thread:$0]  %s262_s2, 3072, %s431_s3, [#allocation3], %s342_s8, %s342_s8, %s343_s9  }
  0xf9   :  { %338 = dma.done.wait [#allocation3], 3072  }
  0xfa   :  { %339 = vsyncadd [#allocation3], 4294964224 }
  0xfb   :  { %271 = vsyncpa [#allocation3], 1 }

</bundles_post_ra>
